<compile_context>
chip_gen: v5e
topology: v5e:2x2
jax: 0.10.0
libtpu: 0.0.40
codegen_flags: <defaults>
</compile_context>

<pallas_src>
import jax
import jax.numpy as jnp
from jax import lax
from jax.experimental import pallas as pl
from jax.experimental.pallas import tpu as pltpu

_LANE = 128
_TB_DEFAULT = 16384   # fits v5e/v6e/v7x with the raised VMEM limit below
_TB_HARD_CAP = 24576  # review: keep tb ~16K-24K per TC for v7x (64 MiB VMEM/TC)


def _round_up(n, m):
    return ((n + m - 1) // m) * m


def _cdiv(a, b):
    return (a + b - 1) // b


def _select_tile(batch, tb_cap):
    """Lane-aligned batch tile: as large as the VMEM budget allows, but with at
    least two (preferably an even number of) grid steps so both v7x TensorCores
    get work on the "parallel" batch axis."""
    tb_cap = _round_up(min(max(int(tb_cap), _LANE), _TB_HARD_CAP), _LANE)
    b128 = _round_up(batch, _LANE)
    n = _cdiv(b128, tb_cap)
    if b128 >= 2 * _LANE:
        n = max(n, 2)          # keep both v7x TCs busy when the batch allows it
        if n % 2:
            n += 1             # even step count -> balanced megacore split
    return min(_round_up(_cdiv(b128, n), _LANE), tb_cap)


def _mlp_kernel(x_ref, w1_ref, b1_ref, w2_ref, b2_ref, o_ref):
    # x: (TB, K) straight from HBM; w1: (H, K); b1: (H, 1); w2: (H, 1);
    # b2: (1, 1) in SMEM; o: (1, TB) lane-dense (batch lives on the lane axis).
    # fc1 on the MXU, contracting K = dim 1 of BOTH operands: the (TB, K) tile is
    # reoriented on-chip instead of via an extra HBM round trip in the wrapper.
    h = lax.dot_general(
        w1_ref[...], x_ref[...],
        dimension_numbers=(((1,), (1,)), ((), ())),
        preferred_element_type=jnp.float32,
    )                                                     # (H, TB), f32 accumulate
    h = jnp.maximum(h + b1_ref[...], 0.0)                 # bias + ReLU, one VPU pass
    y = jnp.sum(h * w2_ref[...], axis=0, keepdims=True)   # fc2: VPU mul + sublane reduce
    o_ref[...] = (y + b2_ref[0, 0]).astype(o_ref.dtype)


def network_with_parameters(x, w1, b1, w2, b2, *, tb=_TB_DEFAULT):
    """x: (B, 10) f32; w1: (10, H); b1: (H,); w2: (H, 1); b2: (1,). Returns (B, 1)."""
    B, K = x.shape
    H = w1.shape[1]

    tb = _select_tile(B, tb)
    grid_n = _cdiv(B, tb)
    b_pad = grid_n * tb

    # x is fed as-is (read from HBM exactly once). Only when the whole batch is
    # smaller than a single tile do we pad it (one fused jnp.pad, tiny). For
    # ragged multi-tile batches the final partial block is handled by Pallas'
    # boundary padding; the garbage lanes are sliced off below.
    x_in = x if B >= tb else jnp.pad(x, ((0, tb - B), (0, 0)))

    w1t = w1.T                                   # (H, K): K on lanes for the MXU
    b1c = b1.reshape(H, 1)                       # broadcasts over the lane (batch) axis
    w2c = w2.reshape(H, 1)
    b2s = b2.reshape(1, 1).astype(jnp.float32)   # scalar bias -> SMEM

    # VMEM budget per TensorCore: the (tb, 10) input tile is lane-padded to
    # (tb, 128) in VMEM (512*tb B per buffer, double-buffered) plus the (1, tb)
    # output buffers and in-kernel temporaries (reoriented x tile, (H, tb)
    # activations). Cap at 48 MiB so it stays inside v7x's 64 MiB/TC VMEM
    # (v5e/v6e have 128 MiB physical, so the raised limit is safe there too).
    vmem_limit = min(2048 * tb + (8 << 20), 48 << 20)

    # Advisory cost: this call is HBM-bound (~44 B/sample vs ~736 flop/sample).
    flops = (2 * K * H + 3 * H) * b_pad
    bytes_accessed = 4 * ((K + 1) * b_pad + H * K + 2 * H + 1)

    out = pl.pallas_call(
        _mlp_kernel,
        out_shape=jax.ShapeDtypeStruct((1, b_pad), jnp.float32),
        grid=(grid_n,),
        in_specs=[
            pl.BlockSpec((tb, K), lambda i: (i, 0)),            # x, streamed once
            pl.BlockSpec((H, K), lambda i: (0, 0)),             # weights stay VMEM-resident
            pl.BlockSpec((H, 1), lambda i: (0, 0)),
            pl.BlockSpec((H, 1), lambda i: (0, 0)),
            pl.BlockSpec(memory_space=pltpu.MemorySpace.SMEM),  # scalar bias in SMEM
        ],
        out_specs=pl.BlockSpec((1, tb), lambda i: (0, i)),      # lane-dense output slab
        compiler_params=pltpu.CompilerParams(
            dimension_semantics=("parallel",),                  # v7x: shard batch over 2 TCs
            vmem_limit_bytes=vmem_limit,
        ),
        cost_estimate=pl.CostEstimate(
            flops=flops, transcendentals=0, bytes_accessed=bytes_accessed),
    )(x_in, w1t, b1c, w2c, b2s)

    # drop batch padding and restore PyTorch's (B, 1) shape (pure view)
    return out[:, :B].reshape(B, 1)


def init_params(key, in_features=10, hidden=32):
    """Deterministic init matching PyTorch nn.Linear default (uniform +/- 1/sqrt(fan_in))."""
    k1, k2, k3, k4 = jax.random.split(key, 4)
    bound1 = 1.0 / jnp.sqrt(in_features)
    bound2 = 1.0 / jnp.sqrt(hidden)
    # stored as [in, out] (transpose of PyTorch's [out, in])
    w1 = jax.random.uniform(k1, (in_features, hidden), jnp.float32, -bound1, bound1)
    b1 = jax.random.uniform(k2, (hidden,), jnp.float32, -bound1, bound1)
    w2 = jax.random.uniform(k3, (hidden, 1), jnp.float32, -bound2, bound2)
    b2 = jax.random.uniform(k4, (1,), jnp.float32, -bound2, bound2)
    return w1, b1, w2, b2


if __name__ == "__main__":
    key = jax.random.PRNGKey(0)
    kx, kp, kx2 = jax.random.split(key, 3)

    in_features = 10
    hidden = 32  # the `param` argument of NetworkWithParameters

    w1, b1, w2, b2 = init_params(kp, in_features, hidden)

    def ref_fwd(xv):
        return jnp.maximum(xv @ w1 + b1, 0.0) @ w2 + b2

    # 1) toy batch (single tile; batch < one tile exercises the fused-pad path)
    batch = 8
    x = jax.random.normal(kx, (batch, in_features), jnp.float32)
    out = jax.block_until_ready(network_with_parameters(x, w1, b1, w2, b2))
    assert out.shape == (batch, 1)
    assert jnp.allclose(out, ref_fwd(x), atol=1e-4, rtol=1e-4)

    # 2) ragged multi-tile batch (2 grid steps; final block boundary-padded by Pallas)
    batch2 = 200
    x2 = jax.random.normal(kx2, (batch2, in_features), jnp.float32)
    out2 = jax.block_until_ready(network_with_parameters(x2, w1, b1, w2, b2))
    assert out2.shape == (batch2, 1)
    assert jnp.allclose(out2, ref_fwd(x2), atol=1e-4, rtol=1e-4)

    print("KERNEL_OK")
</pallas_src>

<mosaic_0001>
module attributes {stable_mosaic.version = 11 : i64} {
  func.func @_mlp_kernel(%arg0: i32, %arg1: memref<128x10xf32, #tpu.memory_space<vmem>>, %arg2: memref<32x10xf32, #tpu.memory_space<vmem>>, %arg3: memref<32x1xf32, #tpu.memory_space<vmem>>, %arg4: memref<32x1xf32, #tpu.memory_space<vmem>>, %arg5: memref<1x1xf32, #tpu.memory_space<smem>>, %arg6: memref<1x128xf32, #tpu.memory_space<vmem>>) attributes {dimension_semantics = [#tpu.dimension_semantics<parallel>], iteration_bounds = array<i64: 1>, scalar_prefetch = 0 : i64, scratch_operands = 0 : i64, tpu.core_type = #tpu.core_type<tc>, window_params = [{transform_indices = @transform_0, window_bounds = array<i64: 128, 10>}, {pipeline_mode = #tpu.pipeline_mode<synchronous>, transform_indices = @transform_1, window_bounds = array<i64: 32, 10>}, {pipeline_mode = #tpu.pipeline_mode<synchronous>, transform_indices = @transform_2, window_bounds = array<i64: 32, 1>}, {pipeline_mode = #tpu.pipeline_mode<synchronous>, transform_indices = @transform_3, window_bounds = array<i64: 32, 1>}, {transform_indices = @transform_4, window_bounds = array<i64: 1, 1>}, {transform_indices = @transform_5, window_bounds = array<i64: 1, 128>}]} {
    %c0 = arith.constant 0 : index
    %c0_0 = arith.constant 0 : index
    %0 = vector.load %arg2[%c0, %c0_0] : memref<32x10xf32, #tpu.memory_space<vmem>>, vector<32x10xf32>
    %c0_1 = arith.constant 0 : index
    %c0_2 = arith.constant 0 : index
    %1 = vector.load %arg1[%c0_1, %c0_2] : memref<128x10xf32, #tpu.memory_space<vmem>>, vector<128x10xf32>
    %cst = arith.constant dense<0.000000e+00> : vector<32x128xf32>
    %2 = tpu.matmul %0, %1, %cst {dimension_numbers = #tpu.dot_dimension_numbers<[1], [1], [0], [0], [0, 0, 1, 0], [], []>} : vector<32x10xf32>, vector<128x10xf32>, vector<32x128xf32> -> vector<32x128xf32>
    %c0_3 = arith.constant 0 : index
    %c0_4 = arith.constant 0 : index
    %3 = vector.load %arg3[%c0_3, %c0_4] : memref<32x1xf32, #tpu.memory_space<vmem>>, vector<32x1xf32>
    %4 = vector.broadcast %3 : vector<32x1xf32> to vector<32x128xf32>
    %5 = arith.addf %2, %4 : vector<32x128xf32>
    %cst_5 = arith.constant 0.000000e+00 : f32
    %6 = vector.broadcast %cst_5 : f32 to vector<32x128xf32>
    %7 = arith.maximumf %5, %6 : vector<32x128xf32>
    %c0_6 = arith.constant 0 : index
    %c0_7 = arith.constant 0 : index
    %8 = vector.load %arg4[%c0_6, %c0_7] : memref<32x1xf32, #tpu.memory_space<vmem>>, vector<32x1xf32>
    %9 = vector.broadcast %8 : vector<32x1xf32> to vector<32x128xf32>
    %10 = arith.mulf %7, %9 : vector<32x128xf32>
    %cst_8 = arith.constant dense<0.000000e+00> : vector<128xf32>
    %11 = vector.multi_reduction <add>, %10, %cst_8 [0] : vector<32x128xf32> to vector<128xf32>
    %12 = vector.shape_cast %11 : vector<128xf32> to vector<1x128xf32>
    %c0_9 = arith.constant 0 : index
    %c0_10 = arith.constant 0 : index
    %13 = memref.load %arg5[%c0_9, %c0_10] : memref<1x1xf32, #tpu.memory_space<smem>>
    %14 = vector.broadcast %13 : f32 to vector<1x128xf32>
    %15 = arith.addf %12, %14 : vector<1x128xf32>
    %c0_11 = arith.constant 0 : index
    %c0_12 = arith.constant 0 : index
    %16 = vector.load %arg6[%c0_11, %c0_12] : memref<1x128xf32, #tpu.memory_space<vmem>>, vector<1x128xf32>
    tpu.vector_store %arg6[%c0_11, %c0_12], %15 {strides = array<i32>} : memref<1x128xf32, #tpu.memory_space<vmem>>, vector<1x128xf32>,
    return
  }
  func.func @transform_0(%arg0: i32) -> (i32, i32) {
    %c0_i32 = arith.constant 0 : i32
    %c0_i32_0 = arith.constant 0 : i32
    return %arg0, %c0_i32 : i32, i32
  }
  func.func @transform_1(%arg0: i32) -> (i32, i32) {
    %c0_i32 = arith.constant 0 : i32
    %c0_i32_0 = arith.constant 0 : i32
    %c0_i32_1 = arith.constant 0 : i32
    return %c0_i32, %c0_i32_0 : i32, i32
  }
  func.func @transform_2(%arg0: i32) -> (i32, i32) {
    %c0_i32 = arith.constant 0 : i32
    %c0_i32_0 = arith.constant 0 : i32
    %c0_i32_1 = arith.constant 0 : i32
    return %c0_i32, %c0_i32_0 : i32, i32
  }
  func.func @transform_3(%arg0: i32) -> (i32, i32) {
    %c0_i32 = arith.constant 0 : i32
    %c0_i32_0 = arith.constant 0 : i32
    %c0_i32_1 = arith.constant 0 : i32
    return %c0_i32, %c0_i32_0 : i32, i32
  }
  func.func @transform_4(%arg0: i32) -> (i32, i32) {
    %c0_i32 = arith.constant 0 : i32
    %c0_i32_0 = arith.constant 0 : i32
    %c0_i32_1 = arith.constant 0 : i32
    return %c0_i32, %c0_i32_0 : i32, i32
  }
  func.func @transform_5(%arg0: i32) -> (i32, i32) {
    %c0_i32 = arith.constant 0 : i32
    %c0_i32_0 = arith.constant 0 : i32
    return %c0_i32, %arg0 : i32, i32
  }
}

</mosaic_0001>

<bundles_post_ra>
// kernel: tpu_custom_call.1
= control target key start
LH: loop header
LB: loop body
LE: loop exit
PB: predicated region body
PF: predicated region fallthrough
CT: control target
= control target key end

     0   :  { %vm66_vm0 = vcmask 80896   ;;  %s506_s0 = inlined_call_operand.vmem [shape: f32[128,10], index: 0, kind: input, shape index: {}]   ;;  %s507_s1 = inlined_call_operand.vmem [shape: f32[32,10], index: 1, kind: input, shape index: {}]   ;;  %s508_s2 = inlined_call_operand.vmem [shape: f32[32,1], index: 2, kind: input, shape index: {}]   ;;  %s509_s3 = inlined_call_operand.vmem [shape: f32[32,1], index: 3, kind: input, shape index: {}]   ;;  %s510_s4 = inlined_call_operand.<no memory space> [shape: f32[1,1], index: 4, kind: input, shape index: {}]   ;;  %s511_s5 = inlined_call_operand.hbm [shape: f32[1,128], index: 5, kind: output, shape index: {}]  }
   0x1   :  { %v41_v0 = vld [vmem:[%s506_s0 + $0x78] sm:$0xff]  ;;  %v40_v1 = vld [vmem:[%s506_s0 + $0x70] sm:$0xff] }
   0x2   :  { %217 = vmatpush.xpose.msk.msra.mxu0 %vm66_vm0, %v41_v0  ;;  %237 = vmatpush.xpose.msk.msra.mxu1 %vm66_vm0, %v41_v0 }
   0x3   :  { %238 = vmatpush.xpose.msk.msra.mxu2 %vm66_vm0, %v41_v0  ;;  %239 = vmatpush.xpose.msk.msra.mxu3 %vm66_vm0, %v41_v0 }
   0x4   :  { %11 = vsyncpa [#allocation4], 0  ;;  %v39_v2 = vld [vmem:[%s506_s0 + $0x68] sm:$0xff]  ;;  %v38_v3 = vld [vmem:[%s506_s0 + $0x60] sm:$0xff]  ;;  %v316_v7 = vmov 0   ;;  %v198_v61 = vstv %s510_s4  ;;  %s317_s22 = smov [#allocation3]  }
   0x5   :  { %v37_v4 = vld [vmem:[%s506_s0 + $0x58] sm:$0xff]  ;;  %v36_v5 = vld [vmem:[%s506_s0 + $0x50] sm:$0xff]  ;;  %v42_v6 = vld [vmem:[%s508_s2] sm:$0xff]  ;;  %287 = vset.pattern.permute.xlu0 %v316_v7  ;;  %288 = vset.pattern.permute.xlu1 %v316_v7  ;;  %s206_s23 = sshll.u32 %s317_s22, 4  ;;  %s208_s25 = sshll.u32 %s511_s5, 4  ;;  %s207_s23 = int_to_ptr.vmem [resolvable:$true] %s206_s23  ;;  %s209_s25 = int_to_ptr.hbm [resolvable:$true] %s208_s25 }
   0x6   :  { %218 = vmatpush.xpose.msk.msra.mxu0 %vm66_vm0, %v40_v1  ;;  %240 = vmatpush.xpose.msk.msra.mxu1 %vm66_vm0, %v40_v1  ;;  %v35_v8 = vld [vmem:[%s506_s0 + $0x48] sm:$0xff]  ;;  %v44_v9 = vld [vmem:[%s508_s2 + $0x10] sm:$0xff]  ;;  %v34_v10 = vld [vmem:[%s506_s0 + $0x40] sm:$0xff] }
   0x7   :  { %241 = vmatpush.xpose.msk.msra.mxu2 %vm66_vm0, %v40_v1  ;;  %242 = vmatpush.xpose.msk.msra.mxu3 %vm66_vm0, %v40_v1  ;;  %v43_v11 = vld [vmem:[%s508_s2 + $0x8] sm:$0xff]  ;;  %v33_v12 = vld [vmem:[%s506_s0 + $0x38] sm:$0xff]  ;;  %v162_v14 = vld [vmem:[%s509_s3 + $0x10] sm:$0xff] }
   0x8   :  { %48 = vperm.xlu0 %287, %v42_v6   ;;  %289 = vset.pattern.permute.xlu2 %v316_v7  ;;  %v45_v13 = vld [vmem:[%s508_s2 + $0x18] sm:$0xff]  ;;  %v160_v15 = vld [vmem:[%s509_s3] sm:$0xff]  ;;  %v32_v16 = vld [vmem:[%s506_s0 + $0x30] sm:$0xff] }
   0x9   :  { %58 = vperm.xlu1 %288, %v44_v9   ;;  %166 = vperm.xlu2 %289, %v160_v15   ;;  %v163_v17 = vld [vmem:[%s509_s3 + $0x18] sm:$0xff]  ;;  %v31_v18 = vld [vmem:[%s506_s0 + $0x28] sm:$0xff]  ;;  %v30_v20 = vld [vmem:[%s506_s0 + $0x20] sm:$0xff] }
   0xa   :  { %219 = vmatpush.xpose.msk.msra.mxu0 %vm66_vm0, %v39_v2  ;;  %243 = vmatpush.xpose.msk.msra.mxu1 %vm66_vm0, %v39_v2  ;;  %v161_v19 = vld [vmem:[%s509_s3 + $0x8] sm:$0xff]  ;;  %v29_v21 = vld [vmem:[%s506_s0 + $0x18] sm:$0xff]  ;;  %v28_v22 = vld [vmem:[%s506_s0 + $0x10] sm:$0xff] }
   0xb   :  { %244 = vmatpush.xpose.msk.msra.mxu2 %vm66_vm0, %v39_v2  ;;  %245 = vmatpush.xpose.msk.msra.mxu3 %vm66_vm0, %v39_v2  ;;  %v27_v23 = vld [vmem:[%s506_s0 + $0x8] sm:$0xff]  ;;  %v26_v24 = vld [vmem:[%s506_s0] sm:$0xff]  ;;  %v24_v27 = vld [vmem:[%s507_s1 + $0x10] sm:$0xff] }
   0xc   :  { %v22_v25 = vld [vmem:[%s507_s1] sm:$0xff]  ;;  %v23_v26 = vld [vmem:[%s507_s1 + $0x8] sm:$0xff]  ;;  %v25_v28 = vld [vmem:[%s507_s1 + $0x18] sm:$0xff] }
   0xe   :  { %220 = vmatpush.xpose.msk.msra.mxu0 %vm66_vm0, %v38_v3  ;;  %246 = vmatpush.xpose.msk.msra.mxu1 %vm66_vm0, %v38_v3 }
   0xf   :  { %247 = vmatpush.xpose.msk.msra.mxu2 %vm66_vm0, %v38_v3  ;;  %248 = vmatpush.xpose.msk.msra.mxu3 %vm66_vm0, %v38_v3 }
  0x10   :  { %53 = vperm.xlu0 %287, %v43_v11  }
  0x11   :  { %63 = vperm.xlu1 %288, %v45_v13   ;;  %171 = vperm.xlu2 %289, %v161_v19  }
  0x12   :  { %221 = vmatpush.xpose.msk.msra.mxu0 %vm66_vm0, %v37_v4  ;;  %249 = vmatpush.xpose.msk.msra.mxu1 %vm66_vm0, %v37_v4 }
  0x13   :  { %250 = vmatpush.xpose.msk.msra.mxu2 %vm66_vm0, %v37_v4  ;;  %251 = vmatpush.xpose.msk.msra.mxu3 %vm66_vm0, %v37_v4 }
  0x16   :  { %222 = vmatpush.xpose.msk.msra.mxu0 %vm66_vm0, %v36_v5  ;;  %252 = vmatpush.xpose.msk.msra.mxu1 %vm66_vm0, %v36_v5 }
  0x17   :  { %253 = vmatpush.xpose.msk.msra.mxu2 %vm66_vm0, %v36_v5  ;;  %254 = vmatpush.xpose.msk.msra.mxu3 %vm66_vm0, %v36_v5 }
  0x18   :  { %176 = vperm.xlu0 %287, %v162_v14  }
  0x19   :  { %181 = vperm.xlu1 %288, %v163_v17  }
  0x1a   :  { %223 = vmatpush.xpose.msk.msra.mxu0 %vm66_vm0, %v35_v8  ;;  %255 = vmatpush.xpose.msk.msra.mxu1 %vm66_vm0, %v35_v8 }
  0x1b   :  { %256 = vmatpush.xpose.msk.msra.mxu2 %vm66_vm0, %v35_v8  ;;  %257 = vmatpush.xpose.msk.msra.mxu3 %vm66_vm0, %v35_v8 }
  0x1e   :  { %224 = vmatpush.xpose.msk.msra.mxu0 %vm66_vm0, %v34_v10  ;;  %258 = vmatpush.xpose.msk.msra.mxu1 %vm66_vm0, %v34_v10 }
  0x1f   :  { %259 = vmatpush.xpose.msk.msra.mxu2 %vm66_vm0, %v34_v10  ;;  %260 = vmatpush.xpose.msk.msra.mxu3 %vm66_vm0, %v34_v10 }
  0x22   :  { %225 = vmatpush.xpose.msk.msra.mxu0 %vm66_vm0, %v33_v12  ;;  %261 = vmatpush.xpose.msk.msra.mxu1 %vm66_vm0, %v33_v12 }
  0x23   :  { %262 = vmatpush.xpose.msk.msra.mxu2 %vm66_vm0, %v33_v12  ;;  %263 = vmatpush.xpose.msk.msra.mxu3 %vm66_vm0, %v33_v12 }
  0x26   :  { %226 = vmatpush.xpose.msk.msra.mxu0 %vm66_vm0, %v32_v16  ;;  %264 = vmatpush.xpose.msk.msra.mxu1 %vm66_vm0, %v32_v16 }
  0x27   :  { %265 = vmatpush.xpose.msk.msra.mxu2 %vm66_vm0, %v32_v16  ;;  %266 = vmatpush.xpose.msk.msra.mxu3 %vm66_vm0, %v32_v16 }
  0x2a   :  { %227 = vmatpush.xpose.msk.msra.mxu0 %vm66_vm0, %v31_v18  ;;  %267 = vmatpush.xpose.msk.msra.mxu1 %vm66_vm0, %v31_v18 }
  0x2b   :  { %268 = vmatpush.xpose.msk.msra.mxu2 %vm66_vm0, %v31_v18  ;;  %269 = vmatpush.xpose.msk.msra.mxu3 %vm66_vm0, %v31_v18 }
  0x2e   :  { %228 = vmatpush.xpose.msk.msra.mxu0 %vm66_vm0, %v30_v20  ;;  %270 = vmatpush.xpose.msk.msra.mxu1 %vm66_vm0, %v30_v20 }
  0x2f   :  { %271 = vmatpush.xpose.msk.msra.mxu2 %vm66_vm0, %v30_v20  ;;  %272 = vmatpush.xpose.msk.msra.mxu3 %vm66_vm0, %v30_v20 }
  0x32   :  { %229 = vmatpush.xpose.msk.msra.mxu0 %vm66_vm0, %v29_v21  ;;  %273 = vmatpush.xpose.msk.msra.mxu1 %vm66_vm0, %v29_v21 }
  0x33   :  { %274 = vmatpush.xpose.msk.msra.mxu2 %vm66_vm0, %v29_v21  ;;  %275 = vmatpush.xpose.msk.msra.mxu3 %vm66_vm0, %v29_v21 }
  0x36   :  { %230 = vmatpush.xpose.msk.msra.mxu0 %vm66_vm0, %v28_v22  ;;  %276 = vmatpush.xpose.msk.msra.mxu1 %vm66_vm0, %v28_v22 }
  0x37   :  { %277 = vmatpush.xpose.msk.msra.mxu2 %vm66_vm0, %v28_v22  ;;  %278 = vmatpush.xpose.msk.msra.mxu3 %vm66_vm0, %v28_v22 }
  0x3a   :  { %231 = vmatpush.xpose.msk.msra.mxu0 %vm66_vm0, %v27_v23  ;;  %279 = vmatpush.xpose.msk.msra.mxu1 %vm66_vm0, %v27_v23 }
  0x3b   :  { %280 = vmatpush.xpose.msk.msra.mxu2 %vm66_vm0, %v27_v23  ;;  %281 = vmatpush.xpose.msk.msra.mxu3 %vm66_vm0, %v27_v23 }
  0x3e   :  { %232 = vmatpush.xpose.msk.msra.mxu0 %vm66_vm0, %v26_v24  ;;  %282 = vmatpush.xpose.msk.msra.mxu1 %vm66_vm0, %v26_v24 }
  0x3f   :  { %283 = vmatpush.xpose.msk.msra.mxu2 %vm66_vm0, %v26_v24  ;;  %284 = vmatpush.xpose.msk.msra.mxu3 %vm66_vm0, %v26_v24 }
  0x41   :  { %233 = vmatmul.msk.f32.vlgmr.msra.gmra.mxu0 %vm66_vm0, %v22_v25  ;;  %234 = vmatmul.msk.f32.vlgmr.msra.gmra.mxu1 %vm66_vm0, %v23_v26 }
  0x42   :  { %235 = vmatmul.msk.f32.vlgmr.msra.gmra.mxu2 %vm66_vm0, %v24_v27  ;;  %236 = vmatmul.msk.f32.vlgmr.msra.gmra.mxu3 %vm66_vm0, %v25_v28 }
  0x63   :  { %v167_v31 = vpop.permute.xlu2 %166 }
  0x6b   :  { %v172_v40 = vpop.permute.xlu2 %171 }
  0x7a   :  { %v49_v29 = vpop.permute.xlu0 %48 }
  0x7b   :  { %v59_v30 = vpop.permute.xlu1 %58 }
  0x82   :  { %v54_v32 = vpop.permute.xlu0 %53 }
  0x83   :  { %v64_v37 = vpop.permute.xlu1 %63 }
  0x8a   :  { %v177_v49 = vpop.permute.xlu0 %176 }
  0x8b   :  { %v182_v52 = vpop.permute.xlu1 %181 }
  0xbe   :  { %v144_v33 = vpop.f32.mrf.mxu0  ;;  %v147_v34 = vpop.f32.mrf.mxu1 }
  0xbf   :  { %v145_v35 = vadd.f32 %v144_v33, %v49_v29  ;;  %v148_v36 = vadd.f32 %v147_v34, %v54_v32 }
  0xc1   :  { %v156_v38 = vmax.f32 %v145_v35, 0.0  ;;  %v157_v39 = vmax.f32 %v148_v36, 0.0 }
  0xc3   :  { %v184_v43 = vmul.f32 %v167_v31, %v156_v38  ;;  %v185_v44 = vmul.f32 %v172_v40, %v157_v39 }
  0xc5   :  { %v150_v41 = vpop.f32.mrf.mxu2  ;;  %v153_v42 = vpop.f32.mrf.mxu3  ;;  %v188_v50 = vadd.f32 %v185_v44, %v184_v43 }
  0xc6   :  { %v151_v45 = vadd.f32 %v150_v41, %v59_v30  ;;  %v154_v46 = vadd.f32 %v153_v42, %v64_v37 }
  0xc8   :  { %v158_v47 = vmax.f32 %v151_v45, 0.0  ;;  %v159_v48 = vmax.f32 %v154_v46, 0.0 }
  0xca   :  { %v186_v51 = vmul.f32 %v177_v49, %v158_v47  ;;  %v187_v54 = vmul.f32 %v182_v52, %v159_v48 }
  0xcc   :  { %v189_v53 = vadd.f32 %v188_v50, %v186_v51 }
  0xce   :  { %v190_v55 = vadd.f32 %v189_v53, %v187_v54 }
  0xd0   :  { %v191_v56 = vrot.slane %v190_v55, 4 }
  0xd2   :  { %v192_v57 = vadd.f32 %v191_v56, %v190_v55 }
  0xd4   :  { %v193_v58 = vrot.slane %v192_v57, 2 }
  0xd6   :  { %v194_v59 = vadd.f32 %v193_v58, %v192_v57 }
  0xd8   :  { %v195_v60 = vrot.slane %v194_v59, 1 }
  0xda   :  { %v196_v62 = vadd.f32 %v195_v60, %v194_v59 }
  0xdc   :  { %v199_v63 = vadd.f32 %v198_v61, %v196_v62 }
  0xde   :  { %200 = vst [vmem:[#allocation3] sm:$0x1] %v199_v63 }
  0xdf   :  { %211 = dma.vmem_to_hbm [thread:$0]  %s207_s23, 16, %s209_s25, [#allocation4]  }
  0xe0   :  { %314 = dma.done.wait [#allocation4], 16  }
  0xe1   :  { %315 = vsyncadd [#allocation4], 4294967280 }
  0xe2   :  { %216 = vsyncpa [#allocation4], 1 }

</bundles_post_ra>
